<compile_context>
chip_gen: v7x
topology: tpu7x:2x2x1
jax: 0.10.0
libtpu: 0.0.40
codegen_flags: <defaults>
</compile_context>

<pallas_src>
import jax
import jax.numpy as jnp
from jax import lax
from jax.experimental import pallas as pl
from jax.experimental.pallas import tpu as pltpu


def _round_up(a: int, b: int) -> int:
    return -(-a // b) * b


def _make_dice_kernel(valid_rows: int, tile_rows: int, chunk_rows: int, ragged: bool):
    """valid_rows = true number of 128-lane feature rows (per batch row)."""
    n_chunks = tile_rows // chunk_rows

    def kernel(x_ref, t_ref, inter_ref, sum_ref):
        k = pl.program_id(2)                       # reduction step within chunk
        p = pl.program_id(1)                       # d-range chunk (parallel)
        g = p * pl.num_programs(2) + k             # logical feature-tile index

        @pl.when(k == 0)
        def _init():
            inter_ref[...] = jnp.zeros(inter_ref.shape, dtype=inter_ref.dtype)
            sum_ref[...] = jnp.zeros(sum_ref.shape, dtype=sum_ref.dtype)

        def chunk_body(c, masked):
            start = c * chunk_rows
            if not isinstance(start, int):
                start = pl.multiple_of(start, chunk_rows)
            xs = x_ref[:, pl.ds(start, chunk_rows), :].astype(jnp.float32)
            ts = t_ref[:, pl.ds(start, chunk_rows), :].astype(jnp.float32)
            if masked:
                # Zero the rows at/after `valid_rows` (ragged / overshoot tile).
                row = lax.broadcasted_iota(jnp.int32, (1, chunk_rows, 128), 1)
                ok = (g * tile_rows + start + row) < valid_rows
                xs = jnp.where(ok, xs, 0.0)
                ts = jnp.where(ok, ts, 0.0)
            bn = xs.shape[0]
            xg = xs.reshape(bn, chunk_rows // 8, 8, 128)
            tg = ts.reshape(bn, chunk_rows // 8, 8, 128)
            # Pure element-wise vreg accumulation; no cross-lane reduce here.
            inter_ref[...] += jnp.sum(xg * tg, axis=1)[None]
            sum_ref[...] += jnp.sum(xg + tg, axis=1)[None]

        def accumulate(masked):
            if n_chunks == 1:
                chunk_body(0, masked)
            else:
                def body(c, carry):
                    chunk_body(c, masked)
                    return carry
                lax.fori_loop(0, n_chunks, body, 0, unroll=n_chunks <= 8)

        if ragged:
            # Pay the iota/compare/select cost only on tiles that need it.
            needs_mask = (g + 1) * tile_rows > valid_rows

            @pl.when(needs_mask)
            def _masked():
                accumulate(True)

            @pl.when(jnp.logical_not(needs_mask))
            def _plain():
                accumulate(False)
        else:
            accumulate(False)

    return kernel


def dice_loss(inp: jax.Array, target: jax.Array) -> jax.Array:
    """Matches PyTorch DiceLoss.forward (smooth=1, mean over batch)."""
    n = target.shape[0]
    x = inp.reshape(n, -1)
    t = target.reshape(n, -1)
    d = x.shape[1]

    # View the feature dim as rows of 128 lanes (free reshape when D%128==0).
    if d % 128 != 0:
        # TODO(synk): replace this pad (one extra HBM pass over x and t) with an
        # in-kernel lane mask on the last 128-lane column tile.
        d_pad = _round_up(d, 128)
        x = jnp.pad(x, ((0, 0), (0, d_pad - d)))
        t = jnp.pad(t, ((0, 0), (0, d_pad - d)))
        d = d_pad
    r = d // 128
    x = x.reshape(n, r, 128)
    t = t.reshape(n, r, 128)

    ix, it = x.dtype.itemsize, t.dtype.itemsize
    # Sublane packing granularity: 8 rows for f32, 16 for bf16, 32 for int8/fp8.
    sub = max(8, 32 // ix, 32 // it)

    # Per-step byte budget / VMEM limit scaled to the chip generation.
    try:
        vmem_cap = int(pltpu.get_tpu_info().vmem_capacity_bytes)
    except Exception:
        vmem_cap = 64 * 1024 * 1024          # conservative default
    if vmem_cap <= 64 * 1024 * 1024:         # v7x-class: 64 MiB per TensorCore
        budget, vmem_limit = 12 * 1024 * 1024, 48 * 1024 * 1024
    else:                                    # v5e / v6e: 128 MiB
        budget, vmem_limit = 24 * 1024 * 1024, 96 * 1024 * 1024

    CHUNK = 256                              # inner-loop rows (mult of 8/16/32)
    row_bytes = 128 * (ix + it)              # one 128-lane feature row, x + t
    acc_bytes = 2 * 8 * 128 * 4              # resident (8,128) f32 accum pair
    full_rows = _round_up(r, sub)

    if full_rows * row_bytes >= budget:
        # Large feature dim: one batch row per block, stream feature tiles.
        bn = 1
        tile_rows = max(CHUNK, (budget // row_bytes) // CHUNK * CHUNK)
        tile_rows = min(tile_rows, _round_up(r, CHUNK))
        chunk_rows = CHUNK
    else:
        # Whole feature range fits in one tile: pack batch rows per block.
        tile_rows = full_rows
        per_row = tile_rows * row_bytes + acc_bytes
        bn = max(1, min(n, budget // per_row))
        if n >= 2:
            bn = min(bn, _round_up(n, 2) // 2)   # keep >= 2 parallel batch tiles
        chunk_rows = next(c for c in (256, 128, 64, 32, 16, 8)
                          if c >= sub and tile_rows % c == 0)

    num_tiles = pl.cdiv(r, tile_rows)
    nb = pl.cdiv(n, bn)
    # Second "parallel" axis: if there is only one batch tile, split the
    # reduction range in two so both v7x TensorCores get work.
    p_chunks = 2 if (nb == 1 and num_tiles >= 2) else 1
    kd = pl.cdiv(num_tiles, p_chunks)
    ragged = (r % tile_rows != 0) or (p_chunks * kd != num_tiles)
    n_out = nb * bn

    if p_chunks * kd == num_tiles:
        def in_map(b, p, k):
            return (b, p * kd + k, 0)
    else:
        def in_map(b, p, k):   # clamp the overshoot tile (its rows are masked)
            return (b, jnp.minimum(p * kd + k, num_tiles - 1), 0)

    in_spec = pl.BlockSpec((bn, tile_rows, 128), in_map)
    out_spec = pl.BlockSpec((1, bn, 8, 128), lambda b, p, k: (p, b, 0, 0))

    kernel = _make_dice_kernel(r, tile_rows, chunk_rows, ragged)

    inter_p, sum_p = pl.pallas_call(
        kernel,
        out_shape=(jax.ShapeDtypeStruct((p_chunks, n_out, 8, 128), jnp.float32),
                   jax.ShapeDtypeStruct((p_chunks, n_out, 8, 128), jnp.float32)),
        grid_spec=pltpu.PrefetchScalarGridSpec(
            num_scalar_prefetch=0,
            grid=(nb, p_chunks, kd),
            in_specs=[in_spec, in_spec],
            out_specs=(out_spec, out_spec),
        ),
        compiler_params=pltpu.CompilerParams(
            dimension_semantics=("parallel", "parallel", "arbitrary"),
            vmem_limit_bytes=vmem_limit,
        ),
    )(x, t)

    # Tiny epilogue in plain JAX: per-batch reduce + dice + mean over batch.
    smooth = jnp.float32(1.0)
    inter = jnp.sum(inter_p, axis=(0, 2, 3))[:n]
    both = jnp.sum(sum_p, axis=(0, 2, 3))[:n]        # sum(x) + sum(t)
    dice = 2.0 * (inter + smooth) / (both + smooth)
    return jnp.float32(1.0) - jnp.sum(dice) / jnp.float32(n)


def _dice_loss_ref(inp, target):
    n = target.shape[0]
    smooth = 1.0
    x = inp.reshape(n, -1).astype(jnp.float32)
    t = target.reshape(n, -1).astype(jnp.float32)
    inter = (x * t).sum(axis=1)
    dice = 2.0 * (inter + smooth) / (x.sum(axis=1) + t.sum(axis=1) + smooth)
    return 1.0 - dice.sum() / n


if __name__ == "__main__":
    key = jax.random.PRNGKey(0)
    k1, k2 = jax.random.split(key)
    # NCHW inputs: sigmoid-activated predictions and binary targets.
    x = jax.nn.sigmoid(jax.random.normal(k1, (2, 4, 16, 16), dtype=jnp.float32))
    y = (jax.random.uniform(k2, (2, 4, 16, 16)) > 0.5).astype(jnp.float32)

    loss = jax.block_until_ready(dice_loss(x, y))
    ref = _dice_loss_ref(x, y)
    assert jnp.allclose(loss, ref, rtol=1e-5, atol=1e-6), (loss, ref)
    print("KERNEL_OK")
</pallas_src>

<mosaic_0001>
module attributes {stable_mosaic.version = 11 : i64} {
  func.func @kernel(%arg0: i32, %arg1: i32, %arg2: i32, %arg3: memref<1x8x128xf32, #tpu.memory_space<vmem>>, %arg4: memref<1x8x128xf32, #tpu.memory_space<vmem>>, %arg5: memref<1x1x8x128xf32, #tpu.memory_space<vmem>>, %arg6: memref<1x1x8x128xf32, #tpu.memory_space<vmem>>) attributes {dimension_semantics = [#tpu.dimension_semantics<parallel>, #tpu.dimension_semantics<parallel>, #tpu.dimension_semantics<arbitrary>], iteration_bounds = array<i64: 2, 1, 1>, scalar_prefetch = 0 : i64, scratch_operands = 0 : i64, tpu.core_type = #tpu.core_type<tc>, window_params = [{transform_indices = @transform_0, window_bounds = array<i64: 1, 8, 128>}, {transform_indices = @transform_1, window_bounds = array<i64: 1, 8, 128>}, {transform_indices = @transform_2, window_bounds = array<i64: 1, 1, 8, 128>}, {transform_indices = @transform_3, window_bounds = array<i64: 1, 1, 8, 128>}]} {
    %c0_i32 = arith.constant 0 : i32
    %0 = arith.cmpi eq, %arg2, %c0_i32 : i32
    %1 = arith.extui %0 : i1 to i32
    %c0_i32_0 = arith.constant 0 : i32
    %2 = arith.cmpi ne, %1, %c0_i32_0 : i32
    scf.if %2 {
      %cst_23 = arith.constant 0.000000e+00 : f32
      %19 = vector.broadcast %cst_23 : f32 to vector<1x1x8x128xf32>
      %c0_24 = arith.constant 0 : index
      %c0_25 = arith.constant 0 : index
      %c0_26 = arith.constant 0 : index
      %c0_27 = arith.constant 0 : index
      %20 = vector.load %arg5[%c0_24, %c0_25, %c0_26, %c0_27] : memref<1x1x8x128xf32, #tpu.memory_space<vmem>>, vector<1x1x8x128xf32>
      tpu.vector_store %arg5[%c0_24, %c0_25, %c0_26, %c0_27], %19 {strides = array<i32>} : memref<1x1x8x128xf32, #tpu.memory_space<vmem>>, vector<1x1x8x128xf32>,
      %cst_28 = arith.constant 0.000000e+00 : f32
      %21 = vector.broadcast %cst_28 : f32 to vector<1x1x8x128xf32>
      %c0_29 = arith.constant 0 : index
      %c0_30 = arith.constant 0 : index
      %c0_31 = arith.constant 0 : index
      %c0_32 = arith.constant 0 : index
      %22 = vector.load %arg6[%c0_29, %c0_30, %c0_31, %c0_32] : memref<1x1x8x128xf32, #tpu.memory_space<vmem>>, vector<1x1x8x128xf32>
      tpu.vector_store %arg6[%c0_29, %c0_30, %c0_31, %c0_32], %21 {strides = array<i32>} : memref<1x1x8x128xf32, #tpu.memory_space<vmem>>, vector<1x1x8x128xf32>,
    } else {
    }
    %c0 = arith.constant 0 : index
    %c0_1 = arith.constant 0 : index
    %c0_2 = arith.constant 0 : index
    %3 = vector.load %arg3[%c0, %c0_1, %c0_2] : memref<1x8x128xf32, #tpu.memory_space<vmem>>, vector<1x8x128xf32>
    %c0_3 = arith.constant 0 : index
    %c0_4 = arith.constant 0 : index
    %c0_5 = arith.constant 0 : index
    %4 = vector.load %arg4[%c0_3, %c0_4, %c0_5] : memref<1x8x128xf32, #tpu.memory_space<vmem>>, vector<1x8x128xf32>
    %5 = vector.shape_cast %3 : vector<1x8x128xf32> to vector<1x1x8x128xf32>
    %6 = vector.shape_cast %4 : vector<1x8x128xf32> to vector<1x1x8x128xf32>
    %c0_6 = arith.constant 0 : index
    %c0_7 = arith.constant 0 : index
    %c0_8 = arith.constant 0 : index
    %c0_9 = arith.constant 0 : index
    %7 = vector.load %arg5[%c0_6, %c0_7, %c0_8, %c0_9] : memref<1x1x8x128xf32, #tpu.memory_space<vmem>>, vector<1x1x8x128xf32>
    %8 = arith.mulf %5, %6 : vector<1x1x8x128xf32>
    %cst = arith.constant dense<0.000000e+00> : vector<1x8x128xf32>
    %9 = vector.multi_reduction <add>, %8, %cst [1] : vector<1x1x8x128xf32> to vector<1x8x128xf32>
    %10 = vector.shape_cast %9 : vector<1x8x128xf32> to vector<1x1x8x128xf32>
    %11 = arith.addf %7, %10 : vector<1x1x8x128xf32>
    %c0_10 = arith.constant 0 : index
    %c0_11 = arith.constant 0 : index
    %c0_12 = arith.constant 0 : index
    %c0_13 = arith.constant 0 : index
    %12 = vector.load %arg5[%c0_10, %c0_11, %c0_12, %c0_13] : memref<1x1x8x128xf32, #tpu.memory_space<vmem>>, vector<1x1x8x128xf32>
    tpu.vector_store %arg5[%c0_10, %c0_11, %c0_12, %c0_13], %11 {strides = array<i32>} : memref<1x1x8x128xf32, #tpu.memory_space<vmem>>, vector<1x1x8x128xf32>,
    %c0_14 = arith.constant 0 : index
    %c0_15 = arith.constant 0 : index
    %c0_16 = arith.constant 0 : index
    %c0_17 = arith.constant 0 : index
    %13 = vector.load %arg6[%c0_14, %c0_15, %c0_16, %c0_17] : memref<1x1x8x128xf32, #tpu.memory_space<vmem>>, vector<1x1x8x128xf32>
    %14 = arith.addf %5, %6 : vector<1x1x8x128xf32>
    %cst_18 = arith.constant dense<0.000000e+00> : vector<1x8x128xf32>
    %15 = vector.multi_reduction <add>, %14, %cst_18 [1] : vector<1x1x8x128xf32> to vector<1x8x128xf32>
    %16 = vector.shape_cast %15 : vector<1x8x128xf32> to vector<1x1x8x128xf32>
    %17 = arith.addf %13, %16 : vector<1x1x8x128xf32>
    %c0_19 = arith.constant 0 : index
    %c0_20 = arith.constant 0 : index
    %c0_21 = arith.constant 0 : index
    %c0_22 = arith.constant 0 : index
    %18 = vector.load %arg6[%c0_19, %c0_20, %c0_21, %c0_22] : memref<1x1x8x128xf32, #tpu.memory_space<vmem>>, vector<1x1x8x128xf32>
    tpu.vector_store %arg6[%c0_19, %c0_20, %c0_21, %c0_22], %17 {strides = array<i32>} : memref<1x1x8x128xf32, #tpu.memory_space<vmem>>, vector<1x1x8x128xf32>,
    return
  }
  func.func @transform_0(%arg0: i32, %arg1: i32, %arg2: i32) -> (i32, i32, i32) {
    %c1_i32 = arith.constant 1 : i32
    %0 = arith.muli %arg1, %c1_i32 : i32
    %1 = arith.addi %0, %arg2 : i32
    %c0_i32 = arith.constant 0 : i32
    %c0_i32_0 = arith.constant 0 : i32
    return %arg0, %1, %c0_i32 : i32, i32, i32
  }
  func.func @transform_1(%arg0: i32, %arg1: i32, %arg2: i32) -> (i32, i32, i32) {
    %c1_i32 = arith.constant 1 : i32
    %0 = arith.muli %arg1, %c1_i32 : i32
    %1 = arith.addi %0, %arg2 : i32
    %c0_i32 = arith.constant 0 : i32
    %c0_i32_0 = arith.constant 0 : i32
    return %arg0, %1, %c0_i32 : i32, i32, i32
  }
  func.func @transform_2(%arg0: i32, %arg1: i32, %arg2: i32) -> (i32, i32, i32, i32) {
    %c0_i32 = arith.constant 0 : i32
    %c0_i32_0 = arith.constant 0 : i32
    %c0_i32_1 = arith.constant 0 : i32
    return %arg1, %arg0, %c0_i32, %c0_i32_0 : i32, i32, i32, i32
  }
  func.func @transform_3(%arg0: i32, %arg1: i32, %arg2: i32) -> (i32, i32, i32, i32) {
    %c0_i32 = arith.constant 0 : i32
    %c0_i32_0 = arith.constant 0 : i32
    %c0_i32_1 = arith.constant 0 : i32
    return %arg1, %arg0, %c0_i32, %c0_i32_0 : i32, i32, i32, i32
  }
}

</mosaic_0001>

<bundles_post_ra>
// kernel: tpu_custom_call.1
= control target key start
LH: loop header
LB: loop body
LE: loop exit
PB: predicated region body
PF: predicated region fallthrough
CT: control target
= control target key end

     0   :  { %9 = vsyncpa [#allocation3], 0  ;;  %s1014_s0 = inlined_call_operand.hbm [shape: f32[2,8,128], index: 0, kind: input, shape index: {}]   ;;  %s1015_s1 = inlined_call_operand.hbm [shape: f32[2,8,128], index: 1, kind: input, shape index: {}]   ;;  %s1016_s2 = inlined_call_operand.hbm [shape: f32[1,2,8,128], index: 2, kind: output, shape index: {0}]   ;;  %s1017_s3 = inlined_call_operand.hbm [shape: f32[1,2,8,128], index: 3, kind: output, shape index: {1}]  }
   0x1   :  { %11 = vsyncpa [#allocation3 + $0x1], 0 }
   0x2   :  { %12 = vsyncpa [#allocation6], 0 }
   0x3   :  { %14 = vsyncpa [#allocation6 + $0x1], 0 }
   0x4   :  { %15 = vsyncpa [#allocation4], 0 }
   0x5   :  { %17 = vsyncpa [#allocation4 + $0x1], 0 }
   0x6   :  { %18 = vsyncpa [#allocation9], 0 }
   0x7   :  { %20 = vsyncpa [#allocation9 + $0x1], 0  ;;  %s765_s12 = smov 0   ;;  %s767_s13 = smov 0  }
   0x8   :  { %s769_s14 = smov 0   ;;  %s771_s15 = smov 0  }
   0x9   :  { %s773_s16 = smov 0   ;;  %s775_s17 = smov 0  }
   0xa LB: > { %s469_s18 = sadd.s32 4294967295, %s739_s17   ;;  %s470_s19 = sadd.s32 4294967294, %s739_s17   ;;  %s739_s17 = sphi %s775_s17, %s26_s17   ;;  %s735_s16 = sphi %s773_s16, %s1037_s16   ;;  %s731_s15 = sphi %s771_s15, %s1036_s15   ;;  %s727_s14 = sphi %s769_s14, %s1035_s14   ;;  %s723_s13 = sphi %s767_s13, %s1034_s13   ;;  %s719_s12 = sphi %s765_s12, %s1033_s12  }
   0xb   : > { %s45_s20 = sadd.s32 1, %s735_s16  ;;  %s56_s21 = sadd.s32 1, %s727_s14 }
   0xc   : > { %p47_p0 = scmp.ge.s32.totalorder %s45_s20, 2  ;;  %p63_p1 = scmp.ne.s32.totalorder %s727_s14, %s723_s13 }
   0xd   : > { %p64_p2 = scmp.eq.s32.totalorder %s739_s17, 0  ;;  %p69_p3 = scmp.ne.s32.totalorder %s723_s13, %s719_s12 }
   0xe   : > { %s1039_s20 = smov (%p47_p0, %s45_s20), 0  ;;  %p70_p5 = scmp.eq.s32.totalorder %s469_s18, 0 }
   0xf   : > { %p806_p4 = por %p64_p2, %p63_p1  ;;  %s51_s23 = ssub.s32 %s735_s16, %s1039_s20 }
  0x10   : > { %p125_p6 = scmp.eq.s32.totalorder %s469_s18, 1  ;;  %p54_p7 = scmp.eq.s32.totalorder %s51_s23, 0 }
  0x11   : > { %p812_p8 = por %p70_p5, %p69_p3  ;;  %p131_p10 = scmp.eq.s32.totalorder %s470_s19, 1 }
  0x12   : > { %p816_p9 = por %p125_p6, %p63_p1  ;;  %p510_p13 = scmp.lt.s32.totalorder %s739_s17, 2 }
  0x13   : > { %s1021_s24 = scalar_select %p812_p8, 1, 0 }
  0x14   : > { %s1022_s25 = scalar_select %p816_p9, 1, 0 }
  0x15   : > { %s821_s26 = scalar_select %p54_p7, %s727_s14, %s56_s21  }
  0x16   : > { %p823_p11 = por %p131_p10, %p69_p3  ;;  %s830_s28 = sand.u32 1, %s727_s14  }
  0x17   : > { %s473_s29 = sshll.u32 %s830_s28, 3  ;;  %s474_s30 = sshll.u32 %s735_s16, 7 }
  0x18   : > { %s1023_s27 = scalar_select %p823_p11, 1, 0 }
  0x19   : > { %s839_s6 = scalar_lea.hbm %s1014_s0, %s474_s30  ;;  %s183_s7 = scalar_lea.vmem [#allocation2], %s473_s29 }
  0x1a   : > { %s192_s8 = sshll.u32 %s183_s7, 4  ;;  %p847_p0 = pnand %p510_p13, %p806_p4  ;;  %s843_s8 = int_to_ptr.vmem [resolvable:$true] %s192_s8 }
  0x1b   : > { %s180_s10 = scalar_lea.sflag [#allocation3], %s830_s28  ;;  %s561_s11 = scalar_lea.hbm %s839_s6, 128 }
  0x1c   : > { %p562_p3 = scmp.ne.s32.totalorder %s839_s6, %s561_s11  ;;  %p563_p5 = pneg %p847_p0 }
  0x1d   : > { %s566_s21 = scalar_lea.hbm %s1014_s0, 256  ;;  %p567_p4 = scmp.lt.u32.totalorder %s839_s6, %s1014_s0 }
  0x1e   : > { %p564_p6 = pnand %p563_p5, %p562_p3  ;;  %p568_p10 = scmp.lt.u32.totalorder %s566_s21, %s561_s11 }
  0x1f   : > { %p570_p12 = scmp.lt.u32.totalorder %s561_s11, %s839_s6 }
  0x20   : > { %p565_p7 = pneg %p564_p6  ;;  %p569_p13 = por %p568_p10, %p567_p4 }
  0x22   : > { %p571_p1 = por %p570_p12, %p569_p13 }
  0x24   : > { %p572_p2 = pnand %p571_p1, %p565_p7 }
  0x26   : > { %575 = shalt.err (!%p572_p2)
}
  0x27   : > { %s576_s4 = scalar_lea.vmem %s843_s8, 128  ;;  %s741_s5 = smov [#allocation2]  }
  0x28   : > { %p577_p3 = scmp.ne.s32.totalorder %s843_s8, %s576_s4  ;;  %s581_s7 = sshll.u32 %s741_s5, 4  ;;  %s582_s7 = int_to_ptr.vmem [resolvable:$false] %s581_s7 }
  0x29   : > { %s583_s18 = scalar_lea.vmem %s582_s7, 256  ;;  %p584_p9 = scmp.lt.s32.totalorder %s843_s8, %s582_s7 }
  0x2a   : > { %p579_p6 = pnand %p577_p3, %p563_p5  ;;  %p585_p4 = scmp.lt.s32.totalorder %s583_s18, %s576_s4 }
  0x2c   : > { %p580_p11 = pneg %p579_p6  ;;  %p586_p10 = por %p585_p4, %p584_p9 }
  0x2e   : > { %p587_p12 = pnand %p586_p10, %p580_p11 }
  0x30   : > { %590 = shalt.err (!%p587_p12)
}
  0x31   : > { %499 = dma.hbm_to_vmem [thread:$0]  (!%p847_p0), %s839_s6, 128, %s843_s8, %s180_s10  }
  0x32   : > { %p1025_p1 = scmp.lt.s32.totalorder %s739_s17, 3  ;;  %p1026_p2 = scmp.ge.s32.totalorder %s739_s17, 1 }
  0x33   : > { %s892_s22 = scalar_lea.hbm %s1015_s1, %s474_s30  ;;  %s203_s23 = scalar_lea.vmem [#allocation5], %s473_s29 }
  0x34   : > { %p883_p7 = pnand %p1026_p2, %p1025_p1  ;;  %s212_s4 = sshll.u32 %s203_s23, 4  ;;  %s213_s4 = int_to_ptr.vmem [resolvable:$true] %s212_s4 }
  0x35   : > { %s200_s6 = scalar_lea.sflag [#allocation6], %s830_s28  ;;  %s591_s8 = scalar_lea.hbm %s892_s22, 128 }
  0x36   : > { %s1027_s11 = scalar_select %p883_p7, 1, 0 }
  0x37   : > { %p592_p9 = scmp.ne.s32.totalorder %s892_s22, %s591_s8  ;;  %s596_s30 = scalar_lea.hbm %s1015_s1, 256 }
  0x38   : > { %p597_p3 = scmp.lt.u32.totalorder %s892_s22, %s1015_s1  ;;  %p598_p6 = scmp.lt.u32.totalorder %s596_s30, %s591_s8 }
  0x39   : > { %p594_p11 = pnand %p592_p9, %p563_p5  ;;  %p600_p10 = scmp.lt.u32.totalorder %s591_s8, %s892_s22 }
  0x3a   : > { %p599_p4 = por %p598_p6, %p597_p3 }
  0x3b   : > { %p595_p13 = pneg %p594_p11 }
  0x3c   : > { %p601_p12 = por %p600_p10, %p599_p4 }
  0x3e   : > { %p602_p1 = pnand %p601_p12, %p595_p13 }
  0x40   : > { %605 = shalt.err (!%p602_p1)
}
  0x41   : > { %s606_s28 = scalar_lea.vmem %s213_s4, 128  ;;  %s742_s29 = smov [#allocation5]  }
  0x42   : > { %p607_p2 = scmp.ne.s32.totalorder %s213_s4, %s606_s28  ;;  %s611_s19 = sshll.u32 %s742_s29, 4  ;;  %s612_s19 = int_to_ptr.vmem [resolvable:$false] %s611_s19 }
  0x43   : > { %s613_s21 = scalar_lea.vmem %s612_s19, 256  ;;  %p614_p8 = scmp.lt.s32.totalorder %s213_s4, %s612_s19 }
  0x44   : > { %p609_p9 = pnand %p607_p2, %p563_p5  ;;  %p615_p7 = scmp.lt.s32.totalorder %s613_s21, %s606_s28 }
  0x46   : > { %p610_p11 = pneg %p609_p9  ;;  %p616_p3 = por %p615_p7, %p614_p8 }
  0x48   : > { %p617_p6 = pnand %p616_p3, %p610_p11 }
  0x4a   : > { %620 = shalt.err (!%p617_p6)
}
  0x4b   : > { %502 = dma.hbm_to_vmem [thread:$0]  (!%p847_p0), %s892_s22, 128, %s213_s4, %s200_s6  }
  0x4c   : > { %p1028_p13 = scmp.ne.s32.totalorder %s1027_s11, 0 }
  0x4d   : > { %s919_s23 = sand.u32 (!%p1028_p13), 1, %s723_s13   ;;  %p1029_p5 = scmp.ne.s32.totalorder (!%p1028_p13), %s1021_s24, 0 }
  0x4e   : > { %221 = sbr.rel (%p1028_p13) target bundleno = 138 (0x8a), region = 28  ;;  %s478_s8 = sshll.u32 (!%p1028_p13), %s919_s23, 3 }
  0x4f   : > { %s224_s10 = scalar_lea.sflag (!%p1028_p13), [#allocation3], %s919_s23  ;;  %s227_s5 = scalar_lea.vmem (!%p1028_p13), [#allocation2], %s478_s8 }
  0x55   : > { %702 = dma.done.wait (%p1029_p5), %s224_s10, 128  }
  0x56   : > { %704 = vsyncadd (%p1029_p5), %s224_s10, 4294967168  ;;  %s233_s9 = scalar_lea.sflag [#allocation6], %s919_s23  ;;  %s236_s22 = scalar_lea.vmem [#allocation5], %s478_s8 }
  0x57   : > { %706 = dma.done.wait (%p1029_p5), %s233_s9, 128  }
  0x58   : > { %708 = vsyncadd (%p1029_p5), %s233_s9, 4294967168  ;;  %s484_s11 = sshll.u32 %s731_s15, 7  ;;  %v277_v0 = vld [vmem:[%s227_s5] sm:$0xff]  ;;  %v278_v1 = vld [vmem:[%s236_s22] sm:$0xff]  ;;  %s261_s4 = scalar_lea.vmem [#allocation7], %s478_s8 }
  0x59   : > { %s310_s6 = sshll.u32 %s261_s4, 4  ;;  %v280_v2 = vmul.f32 %v278_v1, %v277_v0  ;;  %v285_v3 = vadd.f32 %v278_v1, %v277_v0  ;;  %s268_s30 = scalar_lea.vmem [#allocation8], %s478_s8  ;;  %s938_s6 = int_to_ptr.vmem [resolvable:$true] %s310_s6 }
  0x5a   : > { %s325_s7 = sshll.u32 %s268_s30, 4  ;;  %s936_s29 = scalar_lea.hbm %s1016_s2, %s484_s11  ;;  %s945_s7 = int_to_ptr.vmem [resolvable:$true] %s325_s7 }
  0x5b   : > { %s943_s15 = scalar_lea.hbm %s1017_s3, %s484_s11  ;;  %283 = vst [vmem:[%s261_s4] sm:$0xff] %v280_v2  ;;  %288 = vst [vmem:[%s268_s30] sm:$0xff] %v285_v3  ;;  %s290_s21 = scalar_lea.sflag [#allocation4], %s919_s23 }
  0x5c   : > { %s621_s8 = scalar_lea.vmem %s938_s6, 128  ;;  %p1030_p0 = scmp.ne.s32.totalorder %s1022_s25, 0 }
  0x5d   : > { %p622_p8 = scmp.ne.s32.totalorder %s938_s6, %s621_s8  ;;  %s743_s10 = smov [#allocation7]  }
  0x5e   : > { %s625_s5 = sshll.u32 %s743_s10, 4  ;;  %s626_s5 = int_to_ptr.vmem [resolvable:$false] %s625_s5 }
  0x5f   : > { %p623_p7 = pnand %p622_p8, %p1030_p0  ;;  %s627_s9 = scalar_lea.vmem %s626_s5, 256 }
  0x60   : > { %p628_p10 = scmp.lt.s32.totalorder %s938_s6, %s626_s5  ;;  %p629_p12 = scmp.lt.s32.totalorder %s627_s9, %s621_s8 }
  0x61   : > { %p624_p4 = pneg %p623_p7 }
  0x62   : > { %p630_p1 = por %p629_p12, %p628_p10 }
  0x64   : > { %p631_p2 = pnand %p630_p1, %p624_p4 }
  0x66   : > { %634 = shalt.err (!%p631_p2)
}
  0x67   : > { %s635_s22 = scalar_lea.hbm %s936_s29, 128  ;;  %s639_s30 = scalar_lea.hbm %s1016_s2, 256 }
  0x68   : > { %p636_p9 = scmp.ne.s32.totalorder %s936_s29, %s635_s22  ;;  %p640_p6 = scmp.lt.u32.totalorder %s936_s29, %s1016_s2 }
  0x69   : > { %p641_p13 = scmp.lt.u32.totalorder %s639_s30, %s635_s22  ;;  %p643_p8 = scmp.lt.u32.totalorder %s635_s22, %s936_s29 }
  0x6a   : > { %p637_p11 = pnand %p636_p9, %p1030_p0 }
  0x6b   : > { %p642_p5 = por %p641_p13, %p640_p6 }
  0x6c   : > { %p638_p3 = pneg %p637_p11 }
  0x6d   : > { %p644_p7 = por %p643_p8, %p642_p5 }
  0x6f   : > { %p645_p4 = pnand %p644_p7, %p638_p3 }
  0x71   : > { %648 = shalt.err (!%p645_p4)
}
  0x72   : > { %492 = dma.vmem_to_hbm [thread:$0]  (%p1030_p0), %s938_s6, 128, %s936_s29, %s290_s21  }
  0x73   : > { %s295_s24 = scalar_lea.sflag [#allocation9], %s919_s23  ;;  %s649_s19 = scalar_lea.vmem %s945_s7, 128 }
  0x74   : > { %p650_p10 = scmp.ne.s32.totalorder %s945_s7, %s649_s19  ;;  %s744_s8 = smov [#allocation8]  }
  0x75   : > { %s653_s10 = sshll.u32 %s744_s8, 4  ;;  %s654_s10 = int_to_ptr.vmem [resolvable:$false] %s653_s10 }
  0x76   : > { %p651_p12 = pnand %p650_p10, %p1030_p0  ;;  %s655_s5 = scalar_lea.vmem %s654_s10, 256 }
  0x77   : > { %p656_p2 = scmp.lt.s32.totalorder %s945_s7, %s654_s10  ;;  %p657_p9 = scmp.lt.s32.totalorder %s655_s5, %s649_s19 }
  0x78   : > { %p652_p1 = pneg %p651_p12 }
  0x79   : > { %p658_p11 = por %p657_p9, %p656_p2 }
  0x7b   : > { %p659_p3 = pnand %p658_p11, %p652_p1 }
  0x7d   : > { %662 = shalt.err (!%p659_p3)
}
  0x7e   : > { %s663_s23 = scalar_lea.hbm %s943_s15, 128  ;;  %s667_s21 = scalar_lea.hbm %s1017_s3, 256 }
  0x7f   : > { %p664_p6 = scmp.ne.s32.totalorder %s943_s15, %s663_s23  ;;  %p668_p8 = scmp.lt.u32.totalorder %s943_s15, %s1017_s3 }
  0x80   : > { %p669_p7 = scmp.lt.u32.totalorder %s667_s21, %s663_s23  ;;  %p671_p10 = scmp.lt.u32.totalorder %s663_s23, %s943_s15 }
  0x81   : > { %p665_p13 = pnand %p664_p6, %p1030_p0 }
  0x82   : > { %p670_p4 = por %p669_p7, %p668_p8 }
  0x83   : > { %p666_p5 = pneg %p665_p13 }
  0x84   : > { %p672_p12 = por %p671_p10, %p670_p4 }
  0x86   : > { %p673_p1 = pnand %p672_p12, %p666_p5 }
  0x88   : > { %676 = shalt.err (!%p673_p1)
}
  0x89   : > { %493 = dma.vmem_to_hbm [thread:$0]  (%p1030_p0), %s945_s7, 128, %s943_s15, %s295_s24  }
  0x8a PF: > { %s337_s11 = sand.u32 1, %s719_s12   ;;  %p1031_p2 = scmp.ne.s32.totalorder %s1023_s27, 0 }
  0x8b   : > { %p1032_p9 = scmp.ge.s32.totalorder %s739_s17, 2  ;;  %s338_s4 = scalar_lea.sflag [#allocation4], %s337_s11 }
  0x8d   : > { %p504_p11 = pnand %p1032_p9, %p1031_p2 }
  0x8f   : > { %710 = dma.done.wait (!%p504_p11), %s338_s4, 128  }
  0x90   : > { %712 = vsyncadd (!%p504_p11), %s338_s4, 4294967168  ;;  %s347_s30 = scalar_lea.sflag [#allocation9], %s337_s11 }
  0x91   : > { %714 = dma.done.wait (!%p504_p11), %s347_s30, 128  }
  0x92   : > { %716 = vsyncadd (!%p504_p11), %s347_s30, 4294967168  ;;  %s26_s17 = sadd.s32 1, %s739_s17   ;;  %s1033_s12 = smov %s723_s13 }
  0x93   : > { %p23_p3 = scmp.ge.s32.totalorder %s26_s17, 4   ;;  %s1034_s13 = smov %s727_s14 }
  0x94   : > { %s1035_s14 = smov %s821_s26  ;;  %s1036_s15 = smov %s735_s16 }
  0x95   : > { %s1037_s16 = smov %s1039_s20  ;;  %25 = sbr.rel (!%p23_p3) target bundleno = 10 (0xa), region = 107 }
  0x9c   :  { %352 = vsyncpa [#allocation3], 1 }
  0x9d   :  { %354 = vsyncpa [#allocation3 + $0x1], 1 }
  0x9e   :  { %355 = vsyncpa [#allocation6], 1 }
  0x9f   :  { %357 = vsyncpa [#allocation6 + $0x1], 1 }
  0xa0   :  { %358 = vsyncpa [#allocation4], 1 }
  0xa1   :  { %360 = vsyncpa [#allocation4 + $0x1], 1 }
  0xa2   :  { %361 = vsyncpa [#allocation9], 1 }
  0xa3   :  { %363 = vsyncpa [#allocation9 + $0x1], 1 }

</bundles_post_ra>
